<compile_context>
chip_gen: v7x
topology: tpu7x:2x2x1
jax: 0.10.0
libtpu: 0.0.40
codegen_flags: <defaults>
</compile_context>

<pallas_src>
import jax
import jax.numpy as jnp
from jax.experimental import pallas as pl
from jax.experimental.pallas import tpu as pltpu


def _regularizer_metric_kernel(loss_ref, loss_out_ref, ckpt_out_ref):
    # Pure scalar path: one SMEM load, two SMEM stores. No vregs, no DMA tiling.
    x = loss_ref[0]
    loss_out_ref[0] = x
    ckpt_out_ref[0] = -x


@jax.jit
def _regularizer_metric_pallas(epoch_loss):
    x = jnp.asarray(epoch_loss)
    orig_dtype = x.dtype
    orig_shape = x.shape

    # Flat f32[1] scalar in SMEM in; two f32[1] SMEM scalars out
    # (no packed output => no post-call split/slice ops).
    x32 = x.astype(jnp.float32).reshape(1)

    loss_out, ckpt_out = pl.pallas_call(
        _regularizer_metric_kernel,
        out_shape=(
            jax.ShapeDtypeStruct((1,), jnp.float32),
            jax.ShapeDtypeStruct((1,), jnp.float32),
        ),
        in_specs=[pl.BlockSpec(memory_space=pltpu.MemorySpace.SMEM)],
        out_specs=(
            pl.BlockSpec(memory_space=pltpu.MemorySpace.SMEM),
            pl.BlockSpec(memory_space=pltpu.MemorySpace.SMEM),
        ),
        # Tell XLA this custom call is ~free: 1 negate, 12 bytes touched.
        cost_estimate=pl.CostEstimate(flops=2, transcendentals=0,
                                      bytes_accessed=12),
    )(x32)

    # Restore the caller's dtype/shape inside the same jit region (fuses).
    loss = loss_out.reshape(orig_shape).astype(orig_dtype)
    ckpt = ckpt_out.reshape(orig_shape).astype(orig_dtype)
    return {'loss': loss, 'checkpointer': ckpt}


def regularizer_metric_forward(epoch_loss, outputs=None, labels=None,
                               phase=None, config=None, idx=None):
    """JAX/Pallas equivalent of RegularizerMetric.forward.

    Returns a dict with 'loss' (= epoch_loss) and 'checkpointer' (= -epoch_loss).
    outputs/labels/phase/config/idx are unused by the reference forward.
    """
    return _regularizer_metric_pallas(epoch_loss)


if __name__ == "__main__":
    key = jax.random.PRNGKey(0)
    k_loss, k_out, k_lab = jax.random.split(key, 3)

    # Small, deterministic example inputs consistent with a typical training step.
    epoch_loss = jax.random.uniform(k_loss, (), dtype=jnp.float32)  # scalar loss
    outputs = jax.random.normal(k_out, (2, 4), dtype=jnp.float32)   # unused by forward
    labels = jax.random.randint(k_lab, (2,), 0, 4)                  # unused by forward
    phase, config, idx = "train", {}, 0                             # unused by forward

    metrics = regularizer_metric_forward(epoch_loss, outputs, labels, phase, config, idx)
    jax.block_until_ready(metrics)

    # Correctness check against the reference semantics.
    assert metrics['loss'].dtype == epoch_loss.dtype
    assert metrics['loss'].shape == epoch_loss.shape
    assert jnp.allclose(metrics['loss'], epoch_loss)
    assert jnp.allclose(metrics['checkpointer'], -epoch_loss)

    print("KERNEL_OK")
</pallas_src>

<mosaic_0001>
module attributes {stable_mosaic.version = 11 : i64} {
  func.func @_regularizer_metric_kernel(%arg0: memref<1xf32, #tpu.memory_space<smem>>, %arg1: memref<1xf32, #tpu.memory_space<smem>>, %arg2: memref<1xf32, #tpu.memory_space<smem>>) attributes {dimension_semantics = [], scalar_prefetch = 0 : i64, scratch_operands = 0 : i64, tpu.core_type = #tpu.core_type<tc>} {
    %c0 = arith.constant 0 : index
    %0 = memref.load %arg0[%c0] : memref<1xf32, #tpu.memory_space<smem>>
    %c0_0 = arith.constant 0 : index
    %1 = memref.load %arg1[%c0_0] : memref<1xf32, #tpu.memory_space<smem>>
    memref.store %0, %arg1[%c0_0] : memref<1xf32, #tpu.memory_space<smem>>
    %cst = arith.constant 0.000000e+00 : f32
    %2 = arith.subf %cst, %0 : f32
    %c0_1 = arith.constant 0 : index
    %3 = memref.load %arg2[%c0_1] : memref<1xf32, #tpu.memory_space<smem>>
    memref.store %2, %arg2[%c0_1] : memref<1xf32, #tpu.memory_space<smem>>
    return
  }
}

</mosaic_0001>

<bundles_post_ra>
// kernel: _regularizer_metric_pallas.1
= control target key start
LH: loop header
LB: loop body
LE: loop exit
PB: predicated region body
PF: predicated region fallthrough
CT: control target
= control target key end

     0   :  { %9 = vsyncpa [#allocation4], 0  ;;  %s117_s0 = inlined_call_operand.<no memory space> [shape: f32[1], index: 0, kind: input, shape index: {}]   ;;  %s118_s1 = inlined_call_operand.hbm [shape: f32[1], index: 1, kind: output, shape index: {0}]   ;;  %s119_s2 = inlined_call_operand.hbm [shape: f32[1], index: 2, kind: output, shape index: {1}]  }
   0x1   :  { %15 = sst [smem:[#allocation3]] %s117_s0 }
   0x2   :  { %10 = vsyncpa [#allocation6], 0  ;;  %s46_s13 = scalar_lea.hbm %s118_s1, 16 }
   0x3   :  { %p47_p0 = scmp.ne.s32.totalorder %s118_s1, %s46_s13  ;;  %p50_p1 = scmp.lt.u32.totalorder %s46_s13, %s118_s1 }
   0x5   :  { %p52_p2 = pnand %p50_p1, %p47_p0 }
   0x7   :  { %55 = shalt.err (!%p52_p2)
}
   0x8   :  { %s70_s18 = smov [#allocation3]   ;;  %s16_s23 = ssub.f32 0.0, %s117_s0 }
   0x9   :  { %26 = dma.smem_to_hbm %s70_s18, 16, %s118_s1, [#allocation4]  }
   0xa   :  { %18 = sst [smem:[#allocation5]] %s16_s23  ;;  %s56_s26 = scalar_lea.hbm %s119_s2, 16 }
   0xb   :  { %p57_p3 = scmp.ne.s32.totalorder %s119_s2, %s56_s26  ;;  %p60_p4 = scmp.lt.u32.totalorder %s56_s26, %s119_s2 }
   0xd   :  { %p62_p5 = pnand %p60_p4, %p57_p3 }
   0xf   :  { %65 = shalt.err (!%p62_p5)
}
  0x10   :  { %s71_s1 = smov [#allocation5]  }
  0x11   :  { %34 = dma.smem_to_hbm %s71_s1, 16, %s119_s2, [#allocation6]  }
  0x12   :  { %66 = dma.done.wait [#allocation4], 16  }
  0x13   :  { %67 = vsyncadd [#allocation4], 4294967280 }
  0x14   :  { %68 = dma.done.wait [#allocation6], 16  }
  0x15   :  { %69 = vsyncadd [#allocation6], 4294967280 }
  0x16   :  { %41 = sfence }
  0x17   :  { %42 = vsyncpa [#allocation4], 1 }
  0x18   :  { %43 = vsyncpa [#allocation6], 1 }

</bundles_post_ra>
